<compile_context>
chip_gen: v5e
topology: v5e:2x2
jax: 0.10.0
libtpu: 0.0.40
codegen_flags: <defaults>
</compile_context>

<pallas_src>
import jax
import jax.numpy as jnp
from jax.experimental import pallas as pl
from jax.experimental.pallas import tpu as pltpu


def _round_up(n: int, m: int) -> int:
    return ((n + m - 1) // m) * m


def _make_dpp_kernel(compute_alpha: bool, mm_bf16: bool, approx_recip: bool):
    """Fused dpp_layer1 (Linear [+ softmax alphas]) + ReLU + fc_out."""

    def kernel(x_ref, w1_ref, b1_ref, w2_ref, b2_ref, *out_refs):
        if compute_alpha:
            out_ref, alpha_ref = out_refs
        else:
            (out_ref,) = out_refs

        x = x_ref[...]  # (bm, INp); bf16 when mm_bf16

        # dpp_layer1: Linear(in -> hidden); MXU accumulates in f32.
        pre = jnp.dot(x, w1_ref[...], preferred_element_type=jnp.float32) + b1_ref[...]

        if compute_alpha:
            # Softmax over the (padded) hidden dim. Padded columns carry a
            # -1e30 bias, so exp(pre - m) underflows to exactly 0 there and
            # the denominator equals the unpadded softmax denominator.
            m = jnp.max(pre, axis=-1, keepdims=True)
            e = jnp.exp(pre - m)
            denom = jnp.sum(e, axis=-1, keepdims=True)
            alpha = e * pl.reciprocal(denom, approx=approx_recip)
            alpha_ref[...] = alpha.astype(alpha_ref.dtype)

        # relu1 in f32 on the VPU (padded hidden columns: max(-1e30, 0) = 0).
        h = jnp.maximum(pre, 0.0)
        if mm_bf16:
            h = h.astype(jnp.bfloat16)

        # fc_out: Linear(hidden -> output).
        out_ref[...] = (
            jnp.dot(h, w2_ref[...], preferred_element_type=jnp.float32) + b2_ref[...]
        )

    return kernel


def _resident_spec(shape, single_buffer: bool):
    """BlockSpec for a block that never changes across the grid.

    Single-buffering (pl.Buffered(1)) halves its VMEM footprint; fall back to
    the default if this jax version's BlockSpec lacks pipeline_mode.
    """
    if single_buffer:
        try:
            return pl.BlockSpec(shape, lambda i: (0, 0),
                                pipeline_mode=pl.Buffered(1))
        except TypeError:
            pass
    return pl.BlockSpec(shape, lambda i: (0, 0))


def dpp_model_forward(x, w1, b1, w2, b2, return_alpha_flag=False, *,
                      use_bf16_matmul=False, alpha_dtype=jnp.float32,
                      approx_reciprocal=True, slice_feature_dims=True,
                      block_m=1024):
    """Pallas forward for DPPModelBase.

    x : (B, IN) f32
    w1: (IN, H) f32, b1: (1, H) or (H,) f32      -- dpp_layer1 Linear
    w2: (H, O)  f32, b2: (1, O) or (O,) f32      -- fc_out Linear

    use_bf16_matmul: bf16 MXU operands (x/w1/w2). Valid and a DMA/MXU win on
    v5e, v6e and v7x; accumulation + bias/softmax/ReLU stay f32.
    """
    B, IN = x.shape
    H = w1.shape[1]
    O = w2.shape[1]

    # ---- lane-dense padding of ALL feature dims (multiples of 128) ----
    INp = _round_up(IN, 128)
    Hp = _round_up(H, 128)
    Op = _round_up(O, 128)

    w1p = jnp.pad(w1, ((0, INp - IN), (0, Hp - H)))
    # -1e30 on padded hidden columns: kills them under both softmax and ReLU.
    b1p = jnp.pad(b1.reshape(1, -1).astype(jnp.float32),
                  ((0, 0), (0, Hp - H)), constant_values=-1e30)
    w2p = jnp.pad(w2, ((0, Hp - H), (0, Op - O)))
    b2p = jnp.pad(b2.reshape(1, -1).astype(jnp.float32),
                  ((0, 0), (0, Op - O)))

    mm_dtype = jnp.bfloat16 if use_bf16_matmul else jnp.float32
    w1p = w1p.astype(mm_dtype)
    w2p = w2p.astype(mm_dtype)

    # ---- batch tiling: 1-D "parallel" grid, weights/biases stay resident ----
    # bf16 packs 16 rows per sublane group -> round bm to 16 for bf16 tiles.
    bm_unit = 16 if use_bf16_matmul else 8
    if B <= 256:
        bm = _round_up(B, bm_unit)
    else:
        # >= 2 grid steps so v7x's second TensorCore gets work; still large
        # tiles (up to block_m) to amortize per-step overhead on v5e/v6e.
        bm = min(block_m, _round_up(max(256, pl.cdiv(B, 2)), bm_unit))
    bm = max(bm, bm_unit)
    Bp = _round_up(B, bm)

    xc = x.astype(mm_dtype)
    if (Bp != B) or (INp != IN):
        xc = jnp.pad(xc, ((0, Bp - B), (0, INp - IN)))
    grid = (Bp // bm,)

    # ---- VMEM budget: explicit limit sized from the actual tile footprint ----
    mm_bytes = jnp.dtype(mm_dtype).itemsize
    alpha_bytes = jnp.dtype(alpha_dtype).itemsize
    est_vmem = (
        2 * bm * INp * mm_bytes                      # x tile, double-buffered
        + INp * Hp * mm_bytes + Hp * Op * mm_bytes   # resident weights (1 buf)
        + 8 * (Hp + Op) * 4                          # biases (sublane-padded)
        + 2 * bm * Op * 4                            # out tile, double-buffered
        + (2 * bm * Hp * alpha_bytes if return_alpha_flag else 0)
        + bm * Hp * 4                                # f32 `pre` live values
    )
    # Scoped-VMEM defaults: 16 MiB (v5e), 32 MiB (v6e/v7x); v7x physical = 64 MiB.
    vmem_limit = int(min(max(2 * est_vmem + (4 << 20), 32 << 20), 48 << 20))

    flops = 2 * Bp * (INp * Hp + Hp * Op)
    transcendentals = Bp * Hp if return_alpha_flag else 0
    bytes_accessed = int(
        Bp * INp * mm_bytes + INp * Hp * mm_bytes + Hp * Op * mm_bytes
        + Hp * 4 + Op * 4 + Bp * Op * 4
        + (Bp * Hp * alpha_bytes if return_alpha_flag else 0)
    )
    cost = pl.CostEstimate(flops=flops, transcendentals=transcendentals,
                           bytes_accessed=bytes_accessed)
    cparams = pltpu.CompilerParams(dimension_semantics=("parallel",),
                                   vmem_limit_bytes=vmem_limit)

    kernel = _make_dpp_kernel(compute_alpha=return_alpha_flag,
                              mm_bf16=use_bf16_matmul,
                              approx_recip=approx_reciprocal)

    if return_alpha_flag:
        out_shape = (
            jax.ShapeDtypeStruct((Bp, Op), jnp.float32),
            jax.ShapeDtypeStruct((Bp, Hp), alpha_dtype),
        )
        out_specs = (
            pl.BlockSpec((bm, Op), lambda i: (i, 0)),
            pl.BlockSpec((bm, Hp), lambda i: (i, 0)),
        )
    else:
        out_shape = jax.ShapeDtypeStruct((Bp, Op), jnp.float32)
        out_specs = pl.BlockSpec((bm, Op), lambda i: (i, 0))

    def _call(single_buffer_weights):
        in_specs = [
            pl.BlockSpec((bm, INp), lambda i: (i, 0)),          # x: batch-tiled
            _resident_spec((INp, Hp), single_buffer_weights),   # w1
            _resident_spec((1, Hp), single_buffer_weights),     # b1
            _resident_spec((Hp, Op), single_buffer_weights),    # w2
            _resident_spec((1, Op), single_buffer_weights),     # b2
        ]
        return pl.pallas_call(
            kernel,
            grid=grid,
            in_specs=in_specs,
            out_specs=out_specs,
            out_shape=out_shape,
            compiler_params=cparams,
            cost_estimate=cost,
        )(xc, w1p, b1p, w2p, b2p)

    try:
        results = _call(True)
    except Exception:
        # pipeline_mode=pl.Buffered(1) unsupported on this jax/Mosaic build ->
        # fall back to default double-buffered resident weights.
        results = _call(False)

    if return_alpha_flag:
        out_p, alpha_p = results
        if slice_feature_dims:
            return out_p[:B, :O], alpha_p[:B, :H]
        # Padded feature columns of `out` carry only b2's zero padding and
        # padded alpha columns are exactly 0 -- safe to hand downstream.
        return out_p[:B], alpha_p[:B]

    out_p = results
    return out_p[:B, :O] if slice_feature_dims else out_p[:B]


def reference_forward(x, w1, b1, w2, b2):
    pre = x @ w1 + b1.reshape(1, -1)
    alphas = jax.nn.softmax(pre, axis=-1)
    h = jnp.maximum(pre, 0.0)
    return h @ w2 + b2.reshape(1, -1), alphas


if __name__ == "__main__":
    # Small shapes implied by the forward: (batch, in_features) into a dpp
    # layer with hidden_size_dpp features, then Linear(hidden -> output).
    batch = 8
    in_features = 32
    hidden_size_dpp = 32
    output_size = 16

    key = jax.random.PRNGKey(0)
    kx, kw1, kb1, kw2, kb2 = jax.random.split(key, 5)

    x = jax.random.normal(kx, (batch, in_features), dtype=jnp.float32)
    # Parameters stored as (in, out) for direct x @ W + b.
    w1 = jax.random.normal(kw1, (in_features, hidden_size_dpp), dtype=jnp.float32) * 0.1
    b1 = jax.random.normal(kb1, (1, hidden_size_dpp), dtype=jnp.float32) * 0.1
    w2 = jax.random.normal(kw2, (hidden_size_dpp, output_size), dtype=jnp.float32) * 0.1
    b2 = jax.random.normal(kb2, (1, output_size), dtype=jnp.float32) * 0.1

    ref_out, ref_alphas = reference_forward(x, w1, b1, w2, b2)

    # 1) f32 path with alphas (return_alpha_flag=True variant).
    out, alphas = dpp_model_forward(x, w1, b1, w2, b2, return_alpha_flag=True)
    out = jax.block_until_ready(out)
    alphas = jax.block_until_ready(alphas)
    assert out.shape == (batch, output_size)
    assert alphas.shape == (batch, hidden_size_dpp)
    assert jnp.allclose(out, ref_out, atol=1e-5, rtol=1e-5)
    # alphas go through the approximate EUP reciprocal -> slightly looser check.
    assert jnp.allclose(alphas, ref_alphas, atol=1e-3, rtol=1e-3)

    # 2) f32 path without alphas (alpha-free kernel variant: no softmax work).
    out_noalpha = jax.block_until_ready(
        dpp_model_forward(x, w1, b1, w2, b2, return_alpha_flag=False))
    assert out_noalpha.shape == (batch, output_size)
    assert jnp.allclose(out_noalpha, ref_out, atol=1e-5, rtol=1e-5)

    # 3) bf16-MXU path (a win on v5e/v6e/v7x); looser tolerance for bf16 operands.
    out_bf16 = jax.block_until_ready(
        dpp_model_forward(x, w1, b1, w2, b2, return_alpha_flag=False,
                          use_bf16_matmul=True))
    assert jnp.allclose(out_bf16, ref_out, atol=5e-2, rtol=5e-2)

    # 4) bf16 alpha writeback + exact reciprocal (halves the dominant HBM
    #    stream on the alpha path).
    out4, alphas_bf16 = dpp_model_forward(
        x, w1, b1, w2, b2, return_alpha_flag=True,
        alpha_dtype=jnp.bfloat16, approx_reciprocal=False)
    out4 = jax.block_until_ready(out4)
    alphas_bf16 = jax.block_until_ready(alphas_bf16)
    assert alphas_bf16.dtype == jnp.bfloat16
    assert jnp.allclose(out4, ref_out, atol=1e-5, rtol=1e-5)
    assert jnp.allclose(alphas_bf16.astype(jnp.float32), ref_alphas,
                        atol=1e-2, rtol=1e-2)

    print("KERNEL_OK")
</pallas_src>

<mosaic_0001>
module attributes {stable_mosaic.version = 11 : i64} {
  func.func @kernel(%arg0: i32, %arg1: memref<8x128xf32, #tpu.memory_space<vmem>>, %arg2: memref<128x128xf32, #tpu.memory_space<vmem>>, %arg3: memref<1x128xf32, #tpu.memory_space<vmem>>, %arg4: memref<128x128xf32, #tpu.memory_space<vmem>>, %arg5: memref<1x128xf32, #tpu.memory_space<vmem>>, %arg6: memref<8x128xf32, #tpu.memory_space<vmem>>, %arg7: memref<8x128xf32, #tpu.memory_space<vmem>>) attributes {dimension_semantics = [#tpu.dimension_semantics<parallel>], iteration_bounds = array<i64: 1>, scalar_prefetch = 0 : i64, scratch_operands = 0 : i64, tpu.core_type = #tpu.core_type<tc>, window_params = [{transform_indices = @transform_0, window_bounds = array<i64: 8, 128>}, {pipeline_mode = #tpu.pipeline_mode<synchronous>, transform_indices = @transform_1, window_bounds = array<i64: 128, 128>}, {pipeline_mode = #tpu.pipeline_mode<synchronous>, transform_indices = @transform_2, window_bounds = array<i64: 1, 128>}, {pipeline_mode = #tpu.pipeline_mode<synchronous>, transform_indices = @transform_3, window_bounds = array<i64: 128, 128>}, {pipeline_mode = #tpu.pipeline_mode<synchronous>, transform_indices = @transform_4, window_bounds = array<i64: 1, 128>}, {transform_indices = @transform_5, window_bounds = array<i64: 8, 128>}, {transform_indices = @transform_6, window_bounds = array<i64: 8, 128>}]} {
    %c0 = arith.constant 0 : index
    %c0_0 = arith.constant 0 : index
    %0 = vector.load %arg1[%c0, %c0_0] : memref<8x128xf32, #tpu.memory_space<vmem>>, vector<8x128xf32>
    %c0_1 = arith.constant 0 : index
    %c0_2 = arith.constant 0 : index
    %1 = vector.load %arg2[%c0_1, %c0_2] : memref<128x128xf32, #tpu.memory_space<vmem>>, vector<128x128xf32>
    %cst = arith.constant dense<0.000000e+00> : vector<8x128xf32>
    %2 = tpu.matmul %0, %1, %cst {dimension_numbers = #tpu.dot_dimension_numbers<[1], [0], [0], [1], [0, 0, 1, 1], [], []>} : vector<8x128xf32>, vector<128x128xf32>, vector<8x128xf32> -> vector<8x128xf32>
    %c0_3 = arith.constant 0 : index
    %c0_4 = arith.constant 0 : index
    %3 = vector.load %arg3[%c0_3, %c0_4] : memref<1x128xf32, #tpu.memory_space<vmem>>, vector<1x128xf32>
    %4 = vector.broadcast %3 : vector<1x128xf32> to vector<8x128xf32>
    %5 = arith.addf %2, %4 : vector<8x128xf32>
    %cst_5 = arith.constant dense<0xFF800000> : vector<8xf32>
    %6 = vector.multi_reduction <maximumf>, %5, %cst_5 [1] : vector<8x128xf32> to vector<8xf32>
    %7 = vector.shape_cast %6 : vector<8xf32> to vector<8x1xf32>
    %8 = vector.broadcast %7 : vector<8x1xf32> to vector<8x128xf32>
    %9 = arith.subf %5, %8 : vector<8x128xf32>
    %10 = math.exp %9 : vector<8x128xf32>
    %cst_6 = arith.constant dense<0.000000e+00> : vector<8xf32>
    %11 = vector.multi_reduction <add>, %10, %cst_6 [1] : vector<8x128xf32> to vector<8xf32>
    %12 = vector.shape_cast %11 : vector<8xf32> to vector<8x1xf32>
    %13 = tpu.reciprocal %12 {approx = true} : vector<8x1xf32> -> vector<8x1xf32>
    %14 = vector.broadcast %13 : vector<8x1xf32> to vector<8x128xf32>
    %15 = arith.mulf %10, %14 : vector<8x128xf32>
    %c0_7 = arith.constant 0 : index
    %c0_8 = arith.constant 0 : index
    %16 = vector.load %arg7[%c0_7, %c0_8] : memref<8x128xf32, #tpu.memory_space<vmem>>, vector<8x128xf32>
    tpu.vector_store %arg7[%c0_7, %c0_8], %15 {strides = array<i32>} : memref<8x128xf32, #tpu.memory_space<vmem>>, vector<8x128xf32>,
    %cst_9 = arith.constant 0.000000e+00 : f32
    %17 = vector.broadcast %cst_9 : f32 to vector<8x128xf32>
    %18 = arith.maximumf %5, %17 : vector<8x128xf32>
    %c0_10 = arith.constant 0 : index
    %c0_11 = arith.constant 0 : index
    %19 = vector.load %arg4[%c0_10, %c0_11] : memref<128x128xf32, #tpu.memory_space<vmem>>, vector<128x128xf32>
    %cst_12 = arith.constant dense<0.000000e+00> : vector<8x128xf32>
    %20 = tpu.matmul %18, %19, %cst_12 {dimension_numbers = #tpu.dot_dimension_numbers<[1], [0], [0], [1], [0, 0, 1, 1], [], []>} : vector<8x128xf32>, vector<128x128xf32>, vector<8x128xf32> -> vector<8x128xf32>
    %c0_13 = arith.constant 0 : index
    %c0_14 = arith.constant 0 : index
    %21 = vector.load %arg5[%c0_13, %c0_14] : memref<1x128xf32, #tpu.memory_space<vmem>>, vector<1x128xf32>
    %22 = vector.broadcast %21 : vector<1x128xf32> to vector<8x128xf32>
    %23 = arith.addf %20, %22 : vector<8x128xf32>
    %c0_15 = arith.constant 0 : index
    %c0_16 = arith.constant 0 : index
    %24 = vector.load %arg6[%c0_15, %c0_16] : memref<8x128xf32, #tpu.memory_space<vmem>>, vector<8x128xf32>
    tpu.vector_store %arg6[%c0_15, %c0_16], %23 {strides = array<i32>} : memref<8x128xf32, #tpu.memory_space<vmem>>, vector<8x128xf32>,
    return
  }
  func.func @transform_0(%arg0: i32) -> (i32, i32) {
    %c0_i32 = arith.constant 0 : i32
    %c0_i32_0 = arith.constant 0 : i32
    return %arg0, %c0_i32 : i32, i32
  }
  func.func @transform_1(%arg0: i32) -> (i32, i32) {
    %c0_i32 = arith.constant 0 : i32
    %c0_i32_0 = arith.constant 0 : i32
    %c0_i32_1 = arith.constant 0 : i32
    return %c0_i32, %c0_i32_0 : i32, i32
  }
  func.func @transform_2(%arg0: i32) -> (i32, i32) {
    %c0_i32 = arith.constant 0 : i32
    %c0_i32_0 = arith.constant 0 : i32
    %c0_i32_1 = arith.constant 0 : i32
    return %c0_i32, %c0_i32_0 : i32, i32
  }
  func.func @transform_3(%arg0: i32) -> (i32, i32) {
    %c0_i32 = arith.constant 0 : i32
    %c0_i32_0 = arith.constant 0 : i32
    %c0_i32_1 = arith.constant 0 : i32
    return %c0_i32, %c0_i32_0 : i32, i32
  }
  func.func @transform_4(%arg0: i32) -> (i32, i32) {
    %c0_i32 = arith.constant 0 : i32
    %c0_i32_0 = arith.constant 0 : i32
    %c0_i32_1 = arith.constant 0 : i32
    return %c0_i32, %c0_i32_0 : i32, i32
  }
  func.func @transform_5(%arg0: i32) -> (i32, i32) {
    %c0_i32 = arith.constant 0 : i32
    %c0_i32_0 = arith.constant 0 : i32
    return %arg0, %c0_i32 : i32, i32
  }
  func.func @transform_6(%arg0: i32) -> (i32, i32) {
    %c0_i32 = arith.constant 0 : i32
    %c0_i32_0 = arith.constant 0 : i32
    return %arg0, %c0_i32 : i32, i32
  }
}

module attributes {stable_mosaic.version = 11 : i64} {
  func.func @kernel(%arg0: i32, %arg1: memref<8x128xf32, #tpu.memory_space<vmem>>, %arg2: memref<128x128xf32, #tpu.memory_space<vmem>>, %arg3: memref<1x128xf32, #tpu.memory_space<vmem>>, %arg4: memref<128x128xf32, #tpu.memory_space<vmem>>, %arg5: memref<1x128xf32, #tpu.memory_space<vmem>>, %arg6: memref<8x128xf32, #tpu.memory_space<vmem>>, %arg7: memref<8x128xf32, #tpu.memory_space<vmem>>) attributes {dimension_semantics = [#tpu.dimension_semantics<parallel>], iteration_bounds = array<i64: 1>, scalar_prefetch = 0 : i64, scratch_operands = 0 : i64, tpu.core_type = #tpu.core_type<tc>, window_params = [{transform_indices = @transform_0, window_bounds = array<i64: 8, 128>}, {pipeline_mode = #tpu.pipeline_mode<synchronous>, transform_indices = @transform_1, window_bounds = array<i64: 128, 128>}, {pipeline_mode = #tpu.pipeline_mode<synchronous>, transform_indices = @transform_2, window_bounds = array<i64: 1, 128>}, {pipeline_mode = #tpu.pipeline_mode<synchronous>, transform_indices = @transform_3, window_bounds = array<i64: 128, 128>}, {pipeline_mode = #tpu.pipeline_mode<synchronous>, transform_indices = @transform_4, window_bounds = array<i64: 1, 128>}, {transform_indices = @transform_5, window_bounds = array<i64: 8, 128>}, {transform_indices = @transform_6, window_bounds = array<i64: 8, 128>}]} {
    %c0 = arith.constant 0 : index
    %c0_0 = arith.constant 0 : index
    %0 = vector.load %arg1[%c0, %c0_0] : memref<8x128xf32, #tpu.memory_space<vmem>>, vector<8x128xf32>
    %c0_1 = arith.constant 0 : index
    %c0_2 = arith.constant 0 : index
    %1 = vector.load %arg2[%c0_1, %c0_2] : memref<128x128xf32, #tpu.memory_space<vmem>>, vector<128x128xf32>
    %cst = arith.constant dense<0.000000e+00> : vector<8x128xf32>
    %2 = tpu.matmul %0, %1, %cst {dimension_numbers = #tpu.dot_dimension_numbers<[1], [0], [0], [1], [0, 0, 1, 1], [], []>} : vector<8x128xf32>, vector<128x128xf32>, vector<8x128xf32> -> vector<8x128xf32>
    %c0_3 = arith.constant 0 : index
    %c0_4 = arith.constant 0 : index
    %3 = vector.load %arg3[%c0_3, %c0_4] : memref<1x128xf32, #tpu.memory_space<vmem>>, vector<1x128xf32>
    %4 = vector.broadcast %3 : vector<1x128xf32> to vector<8x128xf32>
    %5 = arith.addf %2, %4 : vector<8x128xf32>
    %cst_5 = arith.constant dense<0xFF800000> : vector<8xf32>
    %6 = vector.multi_reduction <maximumf>, %5, %cst_5 [1] : vector<8x128xf32> to vector<8xf32>
    %7 = vector.shape_cast %6 : vector<8xf32> to vector<8x1xf32>
    %8 = vector.broadcast %7 : vector<8x1xf32> to vector<8x128xf32>
    %9 = arith.subf %5, %8 : vector<8x128xf32>
    %10 = math.exp %9 : vector<8x128xf32>
    %cst_6 = arith.constant dense<0.000000e+00> : vector<8xf32>
    %11 = vector.multi_reduction <add>, %10, %cst_6 [1] : vector<8x128xf32> to vector<8xf32>
    %12 = vector.shape_cast %11 : vector<8xf32> to vector<8x1xf32>
    %13 = tpu.reciprocal %12 {approx = true} : vector<8x1xf32> -> vector<8x1xf32>
    %14 = vector.broadcast %13 : vector<8x1xf32> to vector<8x128xf32>
    %15 = arith.mulf %10, %14 : vector<8x128xf32>
    %c0_7 = arith.constant 0 : index
    %c0_8 = arith.constant 0 : index
    %16 = vector.load %arg7[%c0_7, %c0_8] : memref<8x128xf32, #tpu.memory_space<vmem>>, vector<8x128xf32>
    tpu.vector_store %arg7[%c0_7, %c0_8], %15 {strides = array<i32>} : memref<8x128xf32, #tpu.memory_space<vmem>>, vector<8x128xf32>,
    %cst_9 = arith.constant 0.000000e+00 : f32
    %17 = vector.broadcast %cst_9 : f32 to vector<8x128xf32>
    %18 = arith.maximumf %5, %17 : vector<8x128xf32>
    %c0_10 = arith.constant 0 : index
    %c0_11 = arith.constant 0 : index
    %19 = vector.load %arg4[%c0_10, %c0_11] : memref<128x128xf32, #tpu.memory_space<vmem>>, vector<128x128xf32>
    %cst_12 = arith.constant dense<0.000000e+00> : vector<8x128xf32>
    %20 = tpu.matmul %18, %19, %cst_12 {dimension_numbers = #tpu.dot_dimension_numbers<[1], [0], [0], [1], [0, 0, 1, 1], [], []>} : vector<8x128xf32>, vector<128x128xf32>, vector<8x128xf32> -> vector<8x128xf32>
    %c0_13 = arith.constant 0 : index
    %c0_14 = arith.constant 0 : index
    %21 = vector.load %arg5[%c0_13, %c0_14] : memref<1x128xf32, #tpu.memory_space<vmem>>, vector<1x128xf32>
    %22 = vector.broadcast %21 : vector<1x128xf32> to vector<8x128xf32>
    %23 = arith.addf %20, %22 : vector<8x128xf32>
    %c0_15 = arith.constant 0 : index
    %c0_16 = arith.constant 0 : index
    %24 = vector.load %arg6[%c0_15, %c0_16] : memref<8x128xf32, #tpu.memory_space<vmem>>, vector<8x128xf32>
    tpu.vector_store %arg6[%c0_15, %c0_16], %23 {strides = array<i32>} : memref<8x128xf32, #tpu.memory_space<vmem>>, vector<8x128xf32>,
    return
  }
  func.func @transform_0(%arg0: i32) -> (i32, i32) {
    %c0_i32 = arith.constant 0 : i32
    %c0_i32_0 = arith.constant 0 : i32
    return %arg0, %c0_i32 : i32, i32
  }
  func.func @transform_1(%arg0: i32) -> (i32, i32) {
    %c0_i32 = arith.constant 0 : i32
    %c0_i32_0 = arith.constant 0 : i32
    %c0_i32_1 = arith.constant 0 : i32
    return %c0_i32, %c0_i32_0 : i32, i32
  }
  func.func @transform_2(%arg0: i32) -> (i32, i32) {
    %c0_i32 = arith.constant 0 : i32
    %c0_i32_0 = arith.constant 0 : i32
    %c0_i32_1 = arith.constant 0 : i32
    return %c0_i32, %c0_i32_0 : i32, i32
  }
  func.func @transform_3(%arg0: i32) -> (i32, i32) {
    %c0_i32 = arith.constant 0 : i32
    %c0_i32_0 = arith.constant 0 : i32
    %c0_i32_1 = arith.constant 0 : i32
    return %c0_i32, %c0_i32_0 : i32, i32
  }
  func.func @transform_4(%arg0: i32) -> (i32, i32) {
    %c0_i32 = arith.constant 0 : i32
    %c0_i32_0 = arith.constant 0 : i32
    %c0_i32_1 = arith.constant 0 : i32
    return %c0_i32, %c0_i32_0 : i32, i32
  }
  func.func @transform_5(%arg0: i32) -> (i32, i32) {
    %c0_i32 = arith.constant 0 : i32
    %c0_i32_0 = arith.constant 0 : i32
    return %arg0, %c0_i32 : i32, i32
  }
  func.func @transform_6(%arg0: i32) -> (i32, i32) {
    %c0_i32 = arith.constant 0 : i32
    %c0_i32_0 = arith.constant 0 : i32
    return %arg0, %c0_i32 : i32, i32
  }
}

</mosaic_0001>

<bundles_post_ra>
// kernel: tpu_custom_call.1
= control target key start
LH: loop header
LB: loop body
LE: loop exit
PB: predicated region body
PF: predicated region fallthrough
CT: control target
= control target key end

     0   :  { %12 = vsyncpa [#allocation3], 0  ;;  %s400_s0 = inlined_call_operand.hbm [shape: f32[8,128], index: 0, kind: input, shape index: {}]   ;;  %s401_s1 = inlined_call_operand.hbm [shape: f32[128,128], index: 1, kind: input, shape index: {}]   ;;  %s402_s2 = inlined_call_operand.vmem [shape: f32[1,128], index: 2, kind: input, shape index: {}]   ;;  %s403_s3 = inlined_call_operand.hbm [shape: f32[128,128], index: 3, kind: input, shape index: {}]   ;;  %s404_s4 = inlined_call_operand.vmem [shape: f32[1,128], index: 4, kind: input, shape index: {}]   ;;  %s405_s5 = inlined_call_operand.hbm [shape: f32[8,128], index: 5, kind: output, shape index: {0}]   ;;  %s406_s6 = inlined_call_operand.hbm [shape: f32[8,128], index: 6, kind: output, shape index: {1}]  }
   0x1   :  { %13 = vsyncpa [#allocation6], 0 }
   0x2   :  { %14 = vsyncpa [#allocation4], 0  ;;  %s31_s23 = sshll.u32 %s401_s1, 4  ;;  %s32_s23 = int_to_ptr.hbm [resolvable:$true] %s31_s23 }
   0x3   :  { %15 = vsyncpa [#allocation10], 0  ;;  %s337_s24 = smov [#allocation5]   ;;  %s21_s28 = sshll.u32 %s400_s0, 4  ;;  %s22_s28 = int_to_ptr.hbm [resolvable:$true] %s21_s28 }
   0x4   :  { %s33_s25 = sshll.u32 %s337_s24, 4  ;;  %s338_s29 = smov 128   ;;  %s34_s25 = int_to_ptr.vmem [resolvable:$true] %s33_s25 }
   0x5   :  { %s339_s30 = smov 8   ;;  %s340_s7 = smov [#allocation2]  }
   0x6   :  { %39 = dma.hbm_to_vmem [thread:$0]  %s32_s23, 2048, %s34_s25, [#allocation6], %s338_s29, %s338_s29, %s339_s30  }
   0x7   :  { %s23_s8 = sshll.u32 %s340_s7, 4  ;;  %s46_s11 = sshll.u32 %s403_s3, 4  ;;  %s24_s8 = int_to_ptr.vmem [resolvable:$true] %s23_s8  ;;  %s47_s11 = int_to_ptr.hbm [resolvable:$true] %s46_s11 }
   0x8   :  { %26 = dma.hbm_to_vmem [thread:$0]  %s22_s28, 128, %s24_s8, [#allocation3]  }
   0x9   :  { %s341_s1 = smov [#allocation7]  }
   0xa   :  { %s48_s12 = sshll.u32 %s341_s1, 4  ;;  %s49_s12 = int_to_ptr.vmem [resolvable:$true] %s48_s12 }
   0xb   :  { %54 = dma.hbm_to_vmem [thread:$0]  %s47_s11, 2048, %s49_s12, [#allocation6], %s338_s29, %s338_s29, %s339_s30  }
   0xc   :  { %329 = dma.done.wait [#allocation3], 128  }
   0xd   :  { %330 = vsyncadd [#allocation3], 4294967168 }
   0xe   :  { %331 = dma.done.wait [#allocation6], 4096  }
   0xf   :  { %332 = vsyncadd [#allocation6], 4294963200  ;;  %v85_v0 = vld [vmem:[#allocation5 + $0x78] sm:$0xff]  ;;  %v84_v1 = vld [vmem:[#allocation5 + $0x70] sm:$0xff]  ;;  %s342_s15 = smov [#allocation8]   ;;  %s169_s19 = sshll.u32 %s405_s5, 4  ;;  %s170_s19 = int_to_ptr.hbm [resolvable:$true] %s169_s19 }
  0x10   :  { %90 = vmatpush.msra.mxu0 %v85_v0  ;;  %v83_v2 = vld [vmem:[#allocation5 + $0x68] sm:$0xff]  ;;  %v82_v3 = vld [vmem:[#allocation5 + $0x60] sm:$0xff]  ;;  %v136_v4 = vld [vmem:[#allocation7 + $0x78] sm:$0xff]  ;;  %s167_s16 = sshll.u32 %s342_s15, 4  ;;  %s180_s22 = sshll.u32 %s406_s6, 4  ;;  %s168_s16 = int_to_ptr.vmem [resolvable:$true] %s167_s16  ;;  %s181_s22 = int_to_ptr.hbm [resolvable:$true] %s180_s22 }
  0x11   :  { %v81_v5 = vld [vmem:[#allocation5 + $0x58] sm:$0xff]  ;;  %141 = vmatpush.msra.mxu1 %v136_v4  ;;  %v135_v6 = vld [vmem:[#allocation7 + $0x70] sm:$0xff]  ;;  %v134_v7 = vld [vmem:[#allocation7 + $0x68] sm:$0xff] }
  0x12   :  { %91 = vmatpush.msra.mxu0 %v84_v1  ;;  %v80_v8 = vld [vmem:[#allocation5 + $0x50] sm:$0xff]  ;;  %v133_v9 = vld [vmem:[#allocation7 + $0x60] sm:$0xff]  ;;  %v79_v10 = vld [vmem:[#allocation5 + $0x48] sm:$0xff] }
  0x13   :  { %142 = vmatpush.msra.mxu1 %v135_v6  ;;  %v132_v11 = vld [vmem:[#allocation7 + $0x58] sm:$0xff]  ;;  %v78_v12 = vld [vmem:[#allocation5 + $0x40] sm:$0xff]  ;;  %v131_v13 = vld [vmem:[#allocation7 + $0x50] sm:$0xff] }
  0x14   :  { %92 = vmatpush.msra.mxu0 %v83_v2  ;;  %v77_v14 = vld [vmem:[#allocation5 + $0x38] sm:$0xff]  ;;  %v130_v15 = vld [vmem:[#allocation7 + $0x48] sm:$0xff]  ;;  %v76_v16 = vld [vmem:[#allocation5 + $0x30] sm:$0xff] }
  0x15   :  { %143 = vmatpush.msra.mxu1 %v134_v7  ;;  %v129_v17 = vld [vmem:[#allocation7 + $0x40] sm:$0xff]  ;;  %v75_v18 = vld [vmem:[#allocation5 + $0x28] sm:$0xff]  ;;  %v128_v19 = vld [vmem:[#allocation7 + $0x38] sm:$0xff] }
  0x16   :  { %93 = vmatpush.msra.mxu0 %v82_v3  ;;  %v74_v20 = vld [vmem:[#allocation5 + $0x20] sm:$0xff]  ;;  %v127_v21 = vld [vmem:[#allocation7 + $0x30] sm:$0xff]  ;;  %v73_v22 = vld [vmem:[#allocation5 + $0x18] sm:$0xff] }
  0x17   :  { %144 = vmatpush.msra.mxu1 %v133_v9  ;;  %v126_v23 = vld [vmem:[#allocation7 + $0x28] sm:$0xff]  ;;  %v72_v24 = vld [vmem:[#allocation5 + $0x10] sm:$0xff]  ;;  %v125_v25 = vld [vmem:[#allocation7 + $0x20] sm:$0xff] }
  0x18   :  { %94 = vmatpush.msra.mxu0 %v81_v5  ;;  %v71_v26 = vld [vmem:[#allocation5 + $0x8] sm:$0xff]  ;;  %v124_v27 = vld [vmem:[#allocation7 + $0x18] sm:$0xff]  ;;  %v70_v28 = vld [vmem:[#allocation5] sm:$0xff] }
  0x19   :  { %145 = vmatpush.msra.mxu1 %v132_v11  ;;  %v69_v29 = vld [vmem:[#allocation2] sm:$0xff]  ;;  %v123_v30 = vld [vmem:[#allocation7 + $0x10] sm:$0xff]  ;;  %v122_v31 = vld [vmem:[#allocation7 + $0x8] sm:$0xff] }
  0x1a   :  { %95 = vmatpush.msra.mxu0 %v80_v8  ;;  %v121_v32 = vld [vmem:[#allocation7] sm:$0xff]  ;;  %v203_v33 = vld [vmem:[%s402_s2] ss:$0 sm:$0xff]  ;;  %s343_s2 = smov [#allocation9]  }
  0x1b   :  { %146 = vmatpush.msra.mxu1 %v131_v13  ;;  %v204_v40 = vld [vmem:[%s404_s4] ss:$0 sm:$0xff]  ;;  %s178_s20 = sshll.u32 %s343_s2, 4  ;;  %s179_s20 = int_to_ptr.vmem [resolvable:$true] %s178_s20 }
  0x1c   :  { %96 = vmatpush.msra.mxu0 %v79_v10 }
  0x1d   :  { %147 = vmatpush.msra.mxu1 %v130_v15 }
  0x1e   :  { %97 = vmatpush.msra.mxu0 %v78_v12 }
  0x1f   :  { %148 = vmatpush.msra.mxu1 %v129_v17 }
  0x20   :  { %98 = vmatpush.msra.mxu0 %v77_v14 }
  0x21   :  { %149 = vmatpush.msra.mxu1 %v128_v19 }
  0x22   :  { %99 = vmatpush.msra.mxu0 %v76_v16 }
  0x23   :  { %150 = vmatpush.msra.mxu1 %v127_v21 }
  0x24   :  { %100 = vmatpush.msra.mxu0 %v75_v18 }
  0x25   :  { %151 = vmatpush.msra.mxu1 %v126_v23 }
  0x26   :  { %101 = vmatpush.msra.mxu0 %v74_v20 }
  0x27   :  { %152 = vmatpush.msra.mxu1 %v125_v25 }
  0x28   :  { %102 = vmatpush.msra.mxu0 %v73_v22 }
  0x29   :  { %153 = vmatpush.msra.mxu1 %v124_v27 }
  0x2a   :  { %103 = vmatpush.msra.mxu0 %v72_v24 }
  0x2b   :  { %154 = vmatpush.msra.mxu1 %v123_v30 }
  0x2c   :  { %104 = vmatpush.msra.mxu0 %v71_v26 }
  0x2d   :  { %155 = vmatpush.msra.mxu1 %v122_v31 }
  0x2e   :  { %105 = vmatpush.msra.mxu0 %v70_v28 }
  0x2f   :  { %106 = vmatmul.f32.vlgmr.msra.gmra.mxu0 %v69_v29  ;;  %156 = vmatpush.msra.mxu1 %v121_v32 }
  0xac   :  { %v107_v34 = vpop.f32.mrf.mxu0 }
  0xad   :  { %v108_v35 = vadd.f32 %v203_v33, %v107_v34 }
  0xaf   :  { %110 = vmax.xlane.f32.xlu0 %v108_v35  ;;  %v120_v36 = vmax.f32 %v108_v35, 0.0 }
  0xb1   :  { %157 = vmatmul.f32.vlgmr.msra.gmra.mxu1 %v120_v36 }
 0x122   :  { %v111_v37 = vpop.xlane.xlu0 %110 }
 0x123   :  { %v112_v38 = vsub.f32 %v108_v35, %v111_v37 }
 0x125   :  { %v113_v39 = vmul.f32 1.442695, %v112_v38 }
 0x127   :  { %205 = vpow2.f32 %v113_v39 }
 0x12d   :  { %v206_v41 = vpop.eup %205 }
 0x12e   :  { %115 = vadd.xlane.f32.xlu0 %v206_v41  ;;  %v158_v42 = vpop.f32.mrf.mxu1 }
 0x12f   :  { %v159_v43 = vadd.f32 %v204_v40, %v158_v42 }
 0x131   :  { %161 = vst [vmem:[#allocation8] sm:$0xff] %v159_v43 }
 0x132   :  { %172 = dma.vmem_to_hbm [thread:$0]  %s168_s16, 128, %s170_s19, [#allocation4]  }
 0x1a1   :  { %v116_v44 = vpop.xlane.xlu0 %115 }
 0x1a2   :  { %207 = vrcp.f32 %v116_v44 }
 0x1a8   :  { %v208_v45 = vpop.eup %207 }
 0x1a9   :  { %v118_v46 = vmul.f32 %v208_v45, %v206_v41 }
 0x1ab   :  { %119 = vst [vmem:[#allocation9] sm:$0xff] %v118_v46 }
 0x1ac   :  { %183 = dma.vmem_to_hbm [thread:$0]  %s179_s20, 128, %s181_s22, [#allocation10]  }
 0x1ad   :  { %333 = dma.done.wait [#allocation4], 128  }
 0x1ae   :  { %334 = vsyncadd [#allocation4], 4294967168 }
 0x1af   :  { %335 = dma.done.wait [#allocation10], 128  }
 0x1b0   :  { %336 = vsyncadd [#allocation10], 4294967168 }
 0x1b1   :  { %192 = vsyncpa [#allocation3], 1 }
 0x1b2   :  { %193 = vsyncpa [#allocation6], 1 }
 0x1b3   :  { %194 = vsyncpa [#allocation4], 1 }
 0x1b4   :  { %195 = vsyncpa [#allocation10], 1 }

// kernel: tpu_custom_call.1
= control target key start
LH: loop header
LB: loop body
LE: loop exit
PB: predicated region body
PF: predicated region fallthrough
CT: control target
= control target key end

     0   :  { %12 = vsyncpa [#allocation3], 0  ;;  %s400_s0 = inlined_call_operand.hbm [shape: f32[8,128], index: 0, kind: input, shape index: {}]   ;;  %s401_s1 = inlined_call_operand.hbm [shape: f32[128,128], index: 1, kind: input, shape index: {}]   ;;  %s402_s2 = inlined_call_operand.vmem [shape: f32[1,128], index: 2, kind: input, shape index: {}]   ;;  %s403_s3 = inlined_call_operand.hbm [shape: f32[128,128], index: 3, kind: input, shape index: {}]   ;;  %s404_s4 = inlined_call_operand.vmem [shape: f32[1,128], index: 4, kind: input, shape index: {}]   ;;  %s405_s5 = inlined_call_operand.hbm [shape: f32[8,128], index: 5, kind: output, shape index: {0}]   ;;  %s406_s6 = inlined_call_operand.hbm [shape: f32[8,128], index: 6, kind: output, shape index: {1}]  }
   0x1   :  { %13 = vsyncpa [#allocation6], 0 }
   0x2   :  { %14 = vsyncpa [#allocation4], 0  ;;  %s31_s23 = sshll.u32 %s401_s1, 4  ;;  %s32_s23 = int_to_ptr.hbm [resolvable:$true] %s31_s23 }
   0x3   :  { %15 = vsyncpa [#allocation10], 0  ;;  %s337_s24 = smov [#allocation5]   ;;  %s21_s28 = sshll.u32 %s400_s0, 4  ;;  %s22_s28 = int_to_ptr.hbm [resolvable:$true] %s21_s28 }
   0x4   :  { %s33_s25 = sshll.u32 %s337_s24, 4  ;;  %s338_s29 = smov 128   ;;  %s34_s25 = int_to_ptr.vmem [resolvable:$true] %s33_s25 }
   0x5   :  { %s339_s30 = smov 8   ;;  %s340_s7 = smov [#allocation2]  }
   0x6   :  { %39 = dma.hbm_to_vmem [thread:$0]  %s32_s23, 2048, %s34_s25, [#allocation6], %s338_s29, %s338_s29, %s339_s30  }
   0x7   :  { %s23_s8 = sshll.u32 %s340_s7, 4  ;;  %s46_s11 = sshll.u32 %s403_s3, 4  ;;  %s24_s8 = int_to_ptr.vmem [resolvable:$true] %s23_s8  ;;  %s47_s11 = int_to_ptr.hbm [resolvable:$true] %s46_s11 }
   0x8   :  { %26 = dma.hbm_to_vmem [thread:$0]  %s22_s28, 128, %s24_s8, [#allocation3]  }
   0x9   :  { %s341_s1 = smov [#allocation7]  }
   0xa   :  { %s48_s12 = sshll.u32 %s341_s1, 4  ;;  %s49_s12 = int_to_ptr.vmem [resolvable:$true] %s48_s12 }
   0xb   :  { %54 = dma.hbm_to_vmem [thread:$0]  %s47_s11, 2048, %s49_s12, [#allocation6], %s338_s29, %s338_s29, %s339_s30  }
   0xc   :  { %329 = dma.done.wait [#allocation3], 128  }
   0xd   :  { %330 = vsyncadd [#allocation3], 4294967168 }
   0xe   :  { %331 = dma.done.wait [#allocation6], 4096  }
   0xf   :  { %332 = vsyncadd [#allocation6], 4294963200  ;;  %v85_v0 = vld [vmem:[#allocation5 + $0x78] sm:$0xff]  ;;  %v84_v1 = vld [vmem:[#allocation5 + $0x70] sm:$0xff]  ;;  %s342_s15 = smov [#allocation8]   ;;  %s169_s19 = sshll.u32 %s405_s5, 4  ;;  %s170_s19 = int_to_ptr.hbm [resolvable:$true] %s169_s19 }
  0x10   :  { %90 = vmatpush.msra.mxu0 %v85_v0  ;;  %v83_v2 = vld [vmem:[#allocation5 + $0x68] sm:$0xff]  ;;  %v82_v3 = vld [vmem:[#allocation5 + $0x60] sm:$0xff]  ;;  %v136_v4 = vld [vmem:[#allocation7 + $0x78] sm:$0xff]  ;;  %s167_s16 = sshll.u32 %s342_s15, 4  ;;  %s180_s22 = sshll.u32 %s406_s6, 4  ;;  %s168_s16 = int_to_ptr.vmem [resolvable:$true] %s167_s16  ;;  %s181_s22 = int_to_ptr.hbm [resolvable:$true] %s180_s22 }
  0x11   :  { %v81_v5 = vld [vmem:[#allocation5 + $0x58] sm:$0xff]  ;;  %141 = vmatpush.msra.mxu1 %v136_v4  ;;  %v135_v6 = vld [vmem:[#allocation7 + $0x70] sm:$0xff]  ;;  %v134_v7 = vld [vmem:[#allocation7 + $0x68] sm:$0xff] }
  0x12   :  { %91 = vmatpush.msra.mxu0 %v84_v1  ;;  %v80_v8 = vld [vmem:[#allocation5 + $0x50] sm:$0xff]  ;;  %v133_v9 = vld [vmem:[#allocation7 + $0x60] sm:$0xff]  ;;  %v79_v10 = vld [vmem:[#allocation5 + $0x48] sm:$0xff] }
  0x13   :  { %142 = vmatpush.msra.mxu1 %v135_v6  ;;  %v132_v11 = vld [vmem:[#allocation7 + $0x58] sm:$0xff]  ;;  %v78_v12 = vld [vmem:[#allocation5 + $0x40] sm:$0xff]  ;;  %v131_v13 = vld [vmem:[#allocation7 + $0x50] sm:$0xff] }
  0x14   :  { %92 = vmatpush.msra.mxu0 %v83_v2  ;;  %v77_v14 = vld [vmem:[#allocation5 + $0x38] sm:$0xff]  ;;  %v130_v15 = vld [vmem:[#allocation7 + $0x48] sm:$0xff]  ;;  %v76_v16 = vld [vmem:[#allocation5 + $0x30] sm:$0xff] }
  0x15   :  { %143 = vmatpush.msra.mxu1 %v134_v7  ;;  %v129_v17 = vld [vmem:[#allocation7 + $0x40] sm:$0xff]  ;;  %v75_v18 = vld [vmem:[#allocation5 + $0x28] sm:$0xff]  ;;  %v128_v19 = vld [vmem:[#allocation7 + $0x38] sm:$0xff] }
  0x16   :  { %93 = vmatpush.msra.mxu0 %v82_v3  ;;  %v74_v20 = vld [vmem:[#allocation5 + $0x20] sm:$0xff]  ;;  %v127_v21 = vld [vmem:[#allocation7 + $0x30] sm:$0xff]  ;;  %v73_v22 = vld [vmem:[#allocation5 + $0x18] sm:$0xff] }
  0x17   :  { %144 = vmatpush.msra.mxu1 %v133_v9  ;;  %v126_v23 = vld [vmem:[#allocation7 + $0x28] sm:$0xff]  ;;  %v72_v24 = vld [vmem:[#allocation5 + $0x10] sm:$0xff]  ;;  %v125_v25 = vld [vmem:[#allocation7 + $0x20] sm:$0xff] }
  0x18   :  { %94 = vmatpush.msra.mxu0 %v81_v5  ;;  %v71_v26 = vld [vmem:[#allocation5 + $0x8] sm:$0xff]  ;;  %v124_v27 = vld [vmem:[#allocation7 + $0x18] sm:$0xff]  ;;  %v70_v28 = vld [vmem:[#allocation5] sm:$0xff] }
  0x19   :  { %145 = vmatpush.msra.mxu1 %v132_v11  ;;  %v69_v29 = vld [vmem:[#allocation2] sm:$0xff]  ;;  %v123_v30 = vld [vmem:[#allocation7 + $0x10] sm:$0xff]  ;;  %v122_v31 = vld [vmem:[#allocation7 + $0x8] sm:$0xff] }
  0x1a   :  { %95 = vmatpush.msra.mxu0 %v80_v8  ;;  %v121_v32 = vld [vmem:[#allocation7] sm:$0xff]  ;;  %v203_v33 = vld [vmem:[%s402_s2] ss:$0 sm:$0xff]  ;;  %s343_s2 = smov [#allocation9]  }
  0x1b   :  { %146 = vmatpush.msra.mxu1 %v131_v13  ;;  %v204_v40 = vld [vmem:[%s404_s4] ss:$0 sm:$0xff]  ;;  %s178_s20 = sshll.u32 %s343_s2, 4  ;;  %s179_s20 = int_to_ptr.vmem [resolvable:$true] %s178_s20 }
  0x1c   :  { %96 = vmatpush.msra.mxu0 %v79_v10 }
  0x1d   :  { %147 = vmatpush.msra.mxu1 %v130_v15 }
  0x1e   :  { %97 = vmatpush.msra.mxu0 %v78_v12 }
  0x1f   :  { %148 = vmatpush.msra.mxu1 %v129_v17 }
  0x20   :  { %98 = vmatpush.msra.mxu0 %v77_v14 }
  0x21   :  { %149 = vmatpush.msra.mxu1 %v128_v19 }
  0x22   :  { %99 = vmatpush.msra.mxu0 %v76_v16 }
  0x23   :  { %150 = vmatpush.msra.mxu1 %v127_v21 }
  0x24   :  { %100 = vmatpush.msra.mxu0 %v75_v18 }
  0x25   :  { %151 = vmatpush.msra.mxu1 %v126_v23 }
  0x26   :  { %101 = vmatpush.msra.mxu0 %v74_v20 }
  0x27   :  { %152 = vmatpush.msra.mxu1 %v125_v25 }
  0x28   :  { %102 = vmatpush.msra.mxu0 %v73_v22 }
  0x29   :  { %153 = vmatpush.msra.mxu1 %v124_v27 }
  0x2a   :  { %103 = vmatpush.msra.mxu0 %v72_v24 }
  0x2b   :  { %154 = vmatpush.msra.mxu1 %v123_v30 }
  0x2c   :  { %104 = vmatpush.msra.mxu0 %v71_v26 }
  0x2d   :  { %155 = vmatpush.msra.mxu1 %v122_v31 }
  0x2e   :  { %105 = vmatpush.msra.mxu0 %v70_v28 }
  0x2f   :  { %106 = vmatmul.f32.vlgmr.msra.gmra.mxu0 %v69_v29  ;;  %156 = vmatpush.msra.mxu1 %v121_v32 }
  0xac   :  { %v107_v34 = vpop.f32.mrf.mxu0 }
  0xad   :  { %v108_v35 = vadd.f32 %v203_v33, %v107_v34 }
  0xaf   :  { %110 = vmax.xlane.f32.xlu0 %v108_v35  ;;  %v120_v36 = vmax.f32 %v108_v35, 0.0 }
  0xb1   :  { %157 = vmatmul.f32.vlgmr.msra.gmra.mxu1 %v120_v36 }
 0x122   :  { %v111_v37 = vpop.xlane.xlu0 %110 }
 0x123   :  { %v112_v38 = vsub.f32 %v108_v35, %v111_v37 }
 0x125   :  { %v113_v39 = vmul.f32 1.442695, %v112_v38 }
 0x127   :  { %205 = vpow2.f32 %v113_v39 }
 0x12d   :  { %v206_v41 = vpop.eup %205 }
 0x12e   :  { %115 = vadd.xlane.f32.xlu0 %v206_v41  ;;  %v158_v42 = vpop.f32.mrf.mxu1 }
 0x12f   :  { %v159_v43 = vadd.f32 %v204_v40, %v158_v42 }
 0x131   :  { %161 = vst [vmem:[#allocation8] sm:$0xff] %v159_v43 }
 0x132   :  { %172 = dma.vmem_to_hbm [thread:$0]  %s168_s16, 128, %s170_s19, [#allocation4]  }
 0x1a1   :  { %v116_v44 = vpop.xlane.xlu0 %115 }
 0x1a2   :  { %207 = vrcp.f32 %v116_v44 }
 0x1a8   :  { %v208_v45 = vpop.eup %207 }
 0x1a9   :  { %v118_v46 = vmul.f32 %v208_v45, %v206_v41 }
 0x1ab   :  { %119 = vst [vmem:[#allocation9] sm:$0xff] %v118_v46 }
 0x1ac   :  { %183 = dma.vmem_to_hbm [thread:$0]  %s179_s20, 128, %s181_s22, [#allocation10]  }
 0x1ad   :  { %333 = dma.done.wait [#allocation4], 128  }
 0x1ae   :  { %334 = vsyncadd [#allocation4], 4294967168 }
 0x1af   :  { %335 = dma.done.wait [#allocation10], 128  }
 0x1b0   :  { %336 = vsyncadd [#allocation10], 4294967168 }
 0x1b1   :  { %192 = vsyncpa [#allocation3], 1 }
 0x1b2   :  { %193 = vsyncpa [#allocation6], 1 }
 0x1b3   :  { %194 = vsyncpa [#allocation4], 1 }
 0x1b4   :  { %195 = vsyncpa [#allocation10], 1 }

</bundles_post_ra>
